<compile_context>
chip_gen: v6e
topology: v6e:2x2x1
jax: 0.10.0
libtpu: 0.0.40
codegen_flags: <defaults>
</compile_context>

<pallas_src>
import jax
import jax.numpy as jnp
from jax import lax
from jax.experimental import pallas as pl
from jax.experimental.pallas import tpu as pltpu


# ----------------------------------------------------------------------------
# Kernel: one grid-less invocation computes both branches.
#   xt:(B,Dt) xi:(B,Di) wt1:(Dt,H) wi1:(Di,H) b1:(2,H) w2:(2,H,E) b2:(2,E)
#   outputs: ot:(B,E), oi:(B,E)   -- all f32, full-array VMEM blocks.
# ----------------------------------------------------------------------------
def _bimodal_kernel(xt_ref, xi_ref, wt1_ref, wi1_ref, b1_ref, w2_ref, b2_ref,
                    ot_ref, oi_ref):
    def branch(x, w1, b1, w2, b2):
        # Linear -> ReLU -> Linear, f32 with f32 MXU accumulation.
        h = jnp.dot(x, w1, preferred_element_type=jnp.float32) + b1
        h = jnp.maximum(h, 0.0)
        y = jnp.dot(h, w2, preferred_element_type=jnp.float32) + b2
        # F.normalize(p=2, dim=1):  y / max(||y||_2, 1e-12)
        #   == y * rsqrt(max(||y||_2^2, 1e-24))  -> EUP rsqrt, no VPU divide.
        norm_sq = jnp.sum(y * y, axis=-1, keepdims=True)
        return y * lax.rsqrt(jnp.maximum(norm_sq, 1e-24))

    ot_ref[...] = branch(xt_ref[...], wt1_ref[...], b1_ref[0:1, :],
                         w2_ref[0], b2_ref[0:1, :])
    oi_ref[...] = branch(xi_ref[...], wi1_ref[...], b1_ref[1:2, :],
                         w2_ref[1], b2_ref[1:2, :])


def _fused_bimodal_call(xt, xi, wt1, wi1, b1, w2, b2):
    batch, d_text = xt.shape
    d_imp = xi.shape[1]
    hidden = wt1.shape[1]
    emb = w2.shape[2]

    flops = 2 * batch * (d_text * hidden + d_imp * hidden + 2 * hidden * emb)
    bytes_accessed = sum(int(a.size) * a.dtype.itemsize
                         for a in (xt, xi, wt1, wi1, b1, w2, b2))
    bytes_accessed += 2 * batch * emb * 4  # two f32 outputs

    vmem = pl.BlockSpec(memory_space=pltpu.MemorySpace.VMEM)

    return pl.pallas_call(
        _bimodal_kernel,
        out_shape=(jax.ShapeDtypeStruct((batch, emb), jnp.float32),
                   jax.ShapeDtypeStruct((batch, emb), jnp.float32)),
        in_specs=[vmem] * 7,
        out_specs=(vmem, vmem),
        cost_estimate=pl.CostEstimate(
            flops=flops,
            transcendentals=2 * batch,      # one rsqrt per output row
            bytes_accessed=bytes_accessed,
        ),
    )(xt, xi, wt1, wi1, b1, w2, b2)


# ----------------------------------------------------------------------------
# Parameter packing: merge shape-compatible per-branch params into shared
# refs (fewer DMAs / BlockSpecs).  No feature-dim padding needed any more.
# ----------------------------------------------------------------------------
def pack_params(params):
    return {
        "text_w1": params["text_w1"].astype(jnp.float32),           # (Dt, H)
        "imp_w1": params["imp_w1"].astype(jnp.float32),              # (Di, H)
        "b1": jnp.concatenate([params["text_b1"], params["imp_b1"]], axis=0),  # (2, H)
        "w2": jnp.stack([params["text_w2"], params["imp_w2"]]),      # (2, H, E)
        "b2": jnp.concatenate([params["text_b2"], params["imp_b2"]], axis=0),  # (2, E)
    }


@jax.jit
def bimodal_forward(text_input, imp_input, packed):
    """BiModalModel.forward: returns (text_embedding, imp_embedding),
    each L2-normalized along dim=1."""
    # `.float()` in the reference module.
    xt = text_input.astype(jnp.float32)
    xi = imp_input.astype(jnp.float32)
    return _fused_bimodal_call(xt, xi,
                               packed["text_w1"], packed["imp_w1"],
                               packed["b1"], packed["w2"], packed["b2"])


# ----------------------------------------------------------------------------
# Parameter init (stand-in encoders, deterministic).
# ----------------------------------------------------------------------------
def init_params(key, d_text, d_imp, hidden, embedding_dim):
    ks = jax.random.split(key, 8)

    def lin(k, fan_in, fan_out):
        bound = 1.0 / jnp.sqrt(fan_in)
        return jax.random.uniform(k, (fan_in, fan_out), jnp.float32, -bound, bound)

    return {
        "text_w1": lin(ks[0], d_text, hidden),
        "text_b1": jax.random.uniform(ks[1], (1, hidden), jnp.float32, -0.1, 0.1),
        "text_w2": lin(ks[2], hidden, embedding_dim),
        "text_b2": jax.random.uniform(ks[3], (1, embedding_dim), jnp.float32, -0.1, 0.1),
        "imp_w1": lin(ks[4], d_imp, hidden),
        "imp_b1": jax.random.uniform(ks[5], (1, hidden), jnp.float32, -0.1, 0.1),
        "imp_w2": lin(ks[6], hidden, embedding_dim),
        "imp_b2": jax.random.uniform(ks[7], (1, embedding_dim), jnp.float32, -0.1, 0.1),
    }


def _reference_branch(x, w1, b1, w2, b2):
    """Pure-JAX f32 reference (matches the PyTorch module semantics)."""
    h = jnp.maximum(jnp.dot(x, w1) + b1, 0.0)
    y = jnp.dot(h, w2) + b2
    norm = jnp.sqrt(jnp.sum(y * y, axis=1, keepdims=True))
    return y / jnp.maximum(norm, 1e-12)


if __name__ == "__main__":
    key = jax.random.PRNGKey(0)
    k_params, k_text, k_imp = jax.random.split(key, 3)

    batch = 8          # multiple of 8 -> sublane-aligned f32 tiles
    d_text = 32        # text feature dim
    d_imp = 16         # "imp" (impression/image) feature dim
    hidden = 64
    embedding_dim = 32

    params = init_params(k_params, d_text, d_imp, hidden, embedding_dim)
    packed = pack_params(params)

    text_input = jax.random.normal(k_text, (batch, d_text), jnp.float32)
    imp_input = jax.random.normal(k_imp, (batch, d_imp), jnp.float32)

    text_out, imp_out = bimodal_forward(text_input, imp_input, packed)
    jax.block_until_ready((text_out, imp_out))

    # Sanity 1: shapes and unit norm along dim=1 (F.normalize semantics).
    assert text_out.shape == (batch, embedding_dim)
    assert imp_out.shape == (batch, embedding_dim)
    assert jnp.allclose(jnp.linalg.norm(text_out, axis=1), 1.0, atol=1e-4)
    assert jnp.allclose(jnp.linalg.norm(imp_out, axis=1), 1.0, atol=1e-4)

    # Sanity 2: match a pure-JAX f32 reference.
    ref_t = _reference_branch(text_input, params["text_w1"], params["text_b1"],
                              params["text_w2"], params["text_b2"])
    ref_i = _reference_branch(imp_input, params["imp_w1"], params["imp_b1"],
                              params["imp_w2"], params["imp_b2"])
    assert jnp.allclose(text_out, ref_t, atol=1e-3, rtol=1e-3)
    assert jnp.allclose(imp_out, ref_i, atol=1e-3, rtol=1e-3)

    print("KERNEL_OK")
</pallas_src>

<mosaic_0001>
module attributes {stable_mosaic.version = 11 : i64} {
  func.func @_bimodal_kernel(%arg0: memref<8x32xf32, #tpu.memory_space<vmem>>, %arg1: memref<8x16xf32, #tpu.memory_space<vmem>>, %arg2: memref<32x64xf32, #tpu.memory_space<vmem>>, %arg3: memref<16x64xf32, #tpu.memory_space<vmem>>, %arg4: memref<2x64xf32, #tpu.memory_space<vmem>>, %arg5: memref<2x64x32xf32, #tpu.memory_space<vmem>>, %arg6: memref<2x32xf32, #tpu.memory_space<vmem>>, %arg7: memref<8x32xf32, #tpu.memory_space<vmem>>, %arg8: memref<8x32xf32, #tpu.memory_space<vmem>>) attributes {dimension_semantics = [], scalar_prefetch = 0 : i64, scratch_operands = 0 : i64, tpu.core_type = #tpu.core_type<tc>} {
    %c0 = arith.constant 0 : index
    %c0_0 = arith.constant 0 : index
    %0 = vector.load %arg0[%c0, %c0_0] : memref<8x32xf32, #tpu.memory_space<vmem>>, vector<8x32xf32>
    %c0_1 = arith.constant 0 : index
    %c0_2 = arith.constant 0 : index
    %1 = vector.load %arg2[%c0_1, %c0_2] : memref<32x64xf32, #tpu.memory_space<vmem>>, vector<32x64xf32>
    %c0_3 = arith.constant 0 : index
    %c0_4 = arith.constant 0 : index
    %2 = vector.load %arg4[%c0_3, %c0_4] : memref<2x64xf32, #tpu.memory_space<vmem>>, vector<1x64xf32>
    %c0_5 = arith.constant 0 : index
    %c0_6 = arith.constant 0 : index
    %c0_7 = arith.constant 0 : index
    %3 = vector.load %arg5[%c0_5, %c0_6, %c0_7] : memref<2x64x32xf32, #tpu.memory_space<vmem>>, vector<1x64x32xf32>
    %4 = vector.shape_cast %3 : vector<1x64x32xf32> to vector<64x32xf32>
    %c0_8 = arith.constant 0 : index
    %c0_9 = arith.constant 0 : index
    %5 = vector.load %arg6[%c0_8, %c0_9] : memref<2x32xf32, #tpu.memory_space<vmem>>, vector<1x32xf32>
    %cst = arith.constant dense<0.000000e+00> : vector<8x64xf32>
    %6 = tpu.matmul %0, %1, %cst {dimension_numbers = #tpu.dot_dimension_numbers<[1], [0], [0], [1], [0, 0, 1, 1], [], []>} : vector<8x32xf32>, vector<32x64xf32>, vector<8x64xf32> -> vector<8x64xf32>
    %7 = vector.broadcast %2 : vector<1x64xf32> to vector<8x64xf32>
    %8 = arith.addf %6, %7 : vector<8x64xf32>
    %cst_10 = arith.constant 0.000000e+00 : f32
    %9 = vector.broadcast %cst_10 : f32 to vector<8x64xf32>
    %10 = arith.maximumf %8, %9 : vector<8x64xf32>
    %cst_11 = arith.constant dense<0.000000e+00> : vector<8x32xf32>
    %11 = tpu.matmul %10, %4, %cst_11 {dimension_numbers = #tpu.dot_dimension_numbers<[1], [0], [0], [1], [0, 0, 1, 1], [], []>} : vector<8x64xf32>, vector<64x32xf32>, vector<8x32xf32> -> vector<8x32xf32>
    %12 = vector.broadcast %5 : vector<1x32xf32> to vector<8x32xf32>
    %13 = arith.addf %11, %12 : vector<8x32xf32>
    %14 = arith.mulf %13, %13 : vector<8x32xf32>
    %cst_12 = arith.constant dense<0.000000e+00> : vector<8xf32>
    %15 = vector.multi_reduction <add>, %14, %cst_12 [1] : vector<8x32xf32> to vector<8xf32>
    %16 = vector.shape_cast %15 : vector<8xf32> to vector<8x1xf32>
    %cst_13 = arith.constant 1.000000e-24 : f32
    %17 = vector.broadcast %cst_13 : f32 to vector<8x1xf32>
    %18 = arith.maximumf %16, %17 : vector<8x1xf32>
    %19 = math.rsqrt %18 : vector<8x1xf32>
    %20 = vector.broadcast %19 : vector<8x1xf32> to vector<8x32xf32>
    %21 = arith.mulf %13, %20 : vector<8x32xf32>
    %c0_14 = arith.constant 0 : index
    %c0_15 = arith.constant 0 : index
    %22 = vector.load %arg7[%c0_14, %c0_15] : memref<8x32xf32, #tpu.memory_space<vmem>>, vector<8x32xf32>
    tpu.vector_store %arg7[%c0_14, %c0_15], %21 {strides = array<i32>} : memref<8x32xf32, #tpu.memory_space<vmem>>, vector<8x32xf32>,
    %c0_16 = arith.constant 0 : index
    %c0_17 = arith.constant 0 : index
    %23 = vector.load %arg1[%c0_16, %c0_17] : memref<8x16xf32, #tpu.memory_space<vmem>>, vector<8x16xf32>
    %c0_18 = arith.constant 0 : index
    %c0_19 = arith.constant 0 : index
    %24 = vector.load %arg3[%c0_18, %c0_19] : memref<16x64xf32, #tpu.memory_space<vmem>>, vector<16x64xf32>
    %c1 = arith.constant 1 : index
    %c0_20 = arith.constant 0 : index
    %25 = vector.load %arg4[%c1, %c0_20] : memref<2x64xf32, #tpu.memory_space<vmem>>, vector<1x64xf32>
    %c1_21 = arith.constant 1 : index
    %c0_22 = arith.constant 0 : index
    %c0_23 = arith.constant 0 : index
    %26 = vector.load %arg5[%c1_21, %c0_22, %c0_23] : memref<2x64x32xf32, #tpu.memory_space<vmem>>, vector<1x64x32xf32>
    %27 = vector.shape_cast %26 : vector<1x64x32xf32> to vector<64x32xf32>
    %c1_24 = arith.constant 1 : index
    %c0_25 = arith.constant 0 : index
    %28 = vector.load %arg6[%c1_24, %c0_25] : memref<2x32xf32, #tpu.memory_space<vmem>>, vector<1x32xf32>
    %cst_26 = arith.constant dense<0.000000e+00> : vector<8x64xf32>
    %29 = tpu.matmul %23, %24, %cst_26 {dimension_numbers = #tpu.dot_dimension_numbers<[1], [0], [0], [1], [0, 0, 1, 1], [], []>} : vector<8x16xf32>, vector<16x64xf32>, vector<8x64xf32> -> vector<8x64xf32>
    %30 = vector.broadcast %25 : vector<1x64xf32> to vector<8x64xf32>
    %31 = arith.addf %29, %30 : vector<8x64xf32>
    %cst_27 = arith.constant 0.000000e+00 : f32
    %32 = vector.broadcast %cst_27 : f32 to vector<8x64xf32>
    %33 = arith.maximumf %31, %32 : vector<8x64xf32>
    %cst_28 = arith.constant dense<0.000000e+00> : vector<8x32xf32>
    %34 = tpu.matmul %33, %27, %cst_28 {dimension_numbers = #tpu.dot_dimension_numbers<[1], [0], [0], [1], [0, 0, 1, 1], [], []>} : vector<8x64xf32>, vector<64x32xf32>, vector<8x32xf32> -> vector<8x32xf32>
    %35 = vector.broadcast %28 : vector<1x32xf32> to vector<8x32xf32>
    %36 = arith.addf %34, %35 : vector<8x32xf32>
    %37 = arith.mulf %36, %36 : vector<8x32xf32>
    %cst_29 = arith.constant dense<0.000000e+00> : vector<8xf32>
    %38 = vector.multi_reduction <add>, %37, %cst_29 [1] : vector<8x32xf32> to vector<8xf32>
    %39 = vector.shape_cast %38 : vector<8xf32> to vector<8x1xf32>
    %cst_30 = arith.constant 1.000000e-24 : f32
    %40 = vector.broadcast %cst_30 : f32 to vector<8x1xf32>
    %41 = arith.maximumf %39, %40 : vector<8x1xf32>
    %42 = math.rsqrt %41 : vector<8x1xf32>
    %43 = vector.broadcast %42 : vector<8x1xf32> to vector<8x32xf32>
    %44 = arith.mulf %36, %43 : vector<8x32xf32>
    %c0_31 = arith.constant 0 : index
    %c0_32 = arith.constant 0 : index
    %45 = vector.load %arg8[%c0_31, %c0_32] : memref<8x32xf32, #tpu.memory_space<vmem>>, vector<8x32xf32>
    tpu.vector_store %arg8[%c0_31, %c0_32], %44 {strides = array<i32>} : memref<8x32xf32, #tpu.memory_space<vmem>>, vector<8x32xf32>,
    return
  }
}

</mosaic_0001>

<bundles_post_ra>
// kernel: bimodal_forward.1
= control target key start
LH: loop header
LB: loop body
LE: loop exit
PB: predicated region body
PF: predicated region fallthrough
CT: control target
= control target key end

     0   :  { %14 = vsyncpa [#allocation3], 0  ;;  %v566_v1 = vmov 0.0   ;;  %vm567_vm0 = vmmov 0   ;;  %vm228_vm1 = vcmask 130048   ;;  %vm49_vm2 = vcmask 261120   ;;  %s740_s0 = inlined_call_operand.vmem [shape: f32[8,32], index: 0, kind: input, shape index: {}]   ;;  %s741_s1 = inlined_call_operand.vmem [shape: f32[8,16], index: 1, kind: input, shape index: {}]   ;;  %s742_s2 = inlined_call_operand.vmem [shape: f32[32,64], index: 2, kind: input, shape index: {}]   ;;  %s743_s3 = inlined_call_operand.vmem [shape: f32[16,64], index: 3, kind: input, shape index: {}]   ;;  %s744_s4 = inlined_call_operand.vmem [shape: f32[2,64], index: 4, kind: input, shape index: {}]   ;;  %s745_s5 = inlined_call_operand.vmem [shape: f32[2,64,32], index: 5, kind: input, shape index: {}]   ;;  %s746_s6 = inlined_call_operand.vmem [shape: f32[2,32], index: 6, kind: input, shape index: {}]   ;;  %s747_s7 = inlined_call_operand.hbm [shape: f32[8,32], index: 7, kind: output, shape index: {0}]   ;;  %s748_s8 = inlined_call_operand.hbm [shape: f32[8,32], index: 8, kind: output, shape index: {1}]  }
   0x1   :  { %v34_v0 = vld [vmem:[%s742_s2 + $0x18] sm:$0xff]  ;;  %458 = vmatprep.subr.mxu1 %v566_v1  ;;  %v33_v2 = vld [vmem:[%s742_s2 + $0x10] sm:$0xff]  ;;  %488 = vmatprep.subr.mxu0 %v566_v1  ;;  %v212_v3 = vld [vmem:[%s743_s3 + $0x8] sm:$0xff] }
   0x2   :  { %459 = vmatpush3.msra.mxu1 %v34_v0  ;;  %466 = vmatprep.mubr.msk.f32.mxu1 %vm567_vm0, %v566_v1  ;;  %v211_v4 = vld [vmem:[%s743_s3] sm:$0xff]  ;;  %v32_v5 = vld [vmem:[%s742_s2 + $0x8] sm:$0xff] }
   0x3   :  { %460 = vmatprep.subr.mxu1 %v566_v1  ;;  %489 = vmatpush3.msra.mxu0 %v212_v3  ;;  %v210_v6 = vld [vmem:[%s741_s1] sm:$0xff] }
   0x4   :  { %461 = vmatpush3.msra.mxu1 %v33_v2  ;;  %490 = vmatprep.subr.mxu0 %v566_v1  ;;  %v31_v7 = vld [vmem:[%s742_s2] sm:$0xff] }
   0x5   :  { %462 = vmatprep.subr.mxu1 %v566_v1  ;;  %491 = vmatpush3.msra.mxu0 %v211_v4  ;;  %v30_v8 = vld [vmem:[%s740_s0] sm:$0xff] }
   0x6   :  { %463 = vmatpush3.msra.mxu1 %v32_v5  ;;  %492 = vmatprep.mubr.msk.f32.mxu0 %vm567_vm0, %v566_v1 }
   0x7   :  { %15 = vsyncpa [#allocation5], 0  ;;  %464 = vmatprep.subr.mxu1 %v566_v1  ;;  %493 = vmatmul.mubr.msk.f32.vlgmr.msra.gmra.mxu0 %vm228_vm1, %v210_v6  ;;  %v43_v9 = vld [vmem:[%s745_s5 + $0x38] sm:$0xff]  ;;  %v42_v11 = vld [vmem:[%s745_s5 + $0x30] sm:$0xff]  ;;  %vm128_vm3 = vcmask 523264   ;;  %s569_s30 = smov [#allocation4]  }
   0x8   :  { %v427_v10 = vld [vmem:[%s745_s5 + $0x78] sm:$0xff]  ;;  %465 = vmatpush3.msra.mxu1 %v31_v7  ;;  %495 = vmatprep.subr.mxu0 %v566_v1  ;;  %v426_v12 = vld [vmem:[%s745_s5 + $0x70] sm:$0xff]  ;;  %v41_v13 = vld [vmem:[%s745_s5 + $0x28] sm:$0xff]  ;;  %s404_s9 = sshll.u32 %s569_s30, 4  ;;  %s405_s9 = int_to_ptr.vmem [resolvable:$true] %s404_s9 }
   0x9   :  { %467 = vmatmul.mubr.msk.f32.vlgmr.msra.gmra.mxu1 %vm49_vm2, %v30_v8  ;;  %469 = vmatprep.subr.mxu1 %v566_v1  ;;  %v425_v14 = vld [vmem:[%s745_s5 + $0x68] sm:$0xff]  ;;  %v40_v15 = vld [vmem:[%s745_s5 + $0x20] sm:$0xff]  ;;  %v39_v17 = vld [vmem:[%s745_s5 + $0x18] sm:$0xff] }
   0xa   :  { %470 = vmatpush3.msra.mxu1 %v43_v9  ;;  %496 = vmatpush3.msra.mxu0 %v427_v10  ;;  %v424_v16 = vld [vmem:[%s745_s5 + $0x60] sm:$0xff]  ;;  %v38_v18 = vld [vmem:[%s745_s5 + $0x10] sm:$0xff]  ;;  %v423_v19 = vld [vmem:[%s745_s5 + $0x58] sm:$0xff] }
   0xb   :  { %471 = vmatprep.subr.mxu1 %v566_v1  ;;  %497 = vmatprep.subr.mxu0 %v566_v1  ;;  %v37_v20 = vld [vmem:[%s745_s5 + $0x8] sm:$0xff]  ;;  %v422_v21 = vld [vmem:[%s745_s5 + $0x50] sm:$0xff]  ;;  %v36_v22 = vld [vmem:[%s745_s5] sm:$0xff] }
   0xc   :  { %472 = vmatpush3.msra.mxu1 %v42_v11  ;;  %498 = vmatpush3.msra.mxu0 %v426_v12  ;;  %v421_v23 = vld [vmem:[%s745_s5 + $0x48] sm:$0xff]  ;;  %v420_v24 = vld [vmem:[%s745_s5 + $0x40] sm:$0xff] }
   0xd   :  { %473 = vmatprep.subr.mxu1 %v566_v1  ;;  %499 = vmatprep.subr.mxu0 %v566_v1  ;;  %v428_v25 = vld [vmem:[%s744_s4 + $0x1] ss:$0 sm:$0xff]  ;;  %v416_v26 = vld [vmem:[%s744_s4] ss:$0 sm:$0xff]  ;;  %s568_s4 = smov [#allocation2]  }
   0xe   :  { %474 = vmatpush3.msra.mxu1 %v41_v13  ;;  %500 = vmatpush3.msra.mxu0 %v425_v14  ;;  %v430_v35 = vld [vmem:[%s746_s6 + $0x1] ss:$0 sm:$0xff]  ;;  %v418_v36 = vld [vmem:[%s746_s6] ss:$0 sm:$0xff]  ;;  %s394_s6 = sshll.u32 %s568_s4, 4  ;;  %s395_s6 = int_to_ptr.vmem [resolvable:$true] %s394_s6 }
   0xf   :  { %475 = vmatprep.subr.mxu1 %v566_v1  ;;  %501 = vmatprep.subr.mxu0 %v566_v1  ;;  %s522_s10 = scalar_lea.vmem %s395_s6, 128  ;;  %p527_p1 = scmp.lt.s32.totalorder %s395_s6, %s395_s6 }
  0x10   :  { %476 = vmatpush3.msra.mxu1 %v40_v15  ;;  %502 = vmatpush3.msra.mxu0 %v424_v16  ;;  %p523_p0 = scmp.ne.s32.totalorder %s395_s6, %s522_s10  ;;  %p528_p2 = scmp.lt.s32.totalorder %s522_s10, %s522_s10 }
  0x11   :  { %477 = vmatprep.subr.mxu1 %v566_v1  ;;  %503 = vmatprep.subr.mxu0 %v566_v1 }
  0x12   :  { %478 = vmatpush3.msra.mxu1 %v39_v17  ;;  %485 = vmatprep.mubr.msk.f32.mxu1 %vm567_vm0, %v566_v1  ;;  %p529_p3 = por %p528_p2, %p527_p1 }
  0x13   :  { %479 = vmatprep.subr.mxu1 %v566_v1  ;;  %511 = vmatprep.mubr.msk.f32.mxu0 %vm567_vm0, %v566_v1 }
  0x14   :  { %480 = vmatpush3.msra.mxu1 %v38_v18  ;;  %504 = vmatpush3.msra.mxu0 %v423_v19  ;;  %p530_p4 = pnand %p529_p3, %p523_p0 }
  0x15   :  { %481 = vmatprep.subr.mxu1 %v566_v1  ;;  %505 = vmatprep.subr.mxu0 %v566_v1 }
  0x16   :  { %482 = vmatpush3.msra.mxu1 %v37_v20  ;;  %506 = vmatpush3.msra.mxu0 %v422_v21 }
  0x17   :  { %483 = vmatprep.subr.mxu1 %v566_v1  ;;  %507 = vmatprep.subr.mxu0 %v566_v1 }
  0x18   :  { %484 = vmatpush3.msra.mxu1 %v36_v22  ;;  %508 = vmatpush3.msra.mxu0 %v421_v23 }
  0x19   :  { %509 = vmatprep.subr.mxu0 %v566_v1 }
  0x1a   :  { %510 = vmatpush3.msra.mxu0 %v420_v24 }
  0xc7   :  { %v298_v27 = vpop.f32.mrf.mxu0 }
  0xc8   :  { %v299_v28 = vadd.f32 %v428_v25, %v298_v27 }
  0xc9   :  { %v119_v29 = vpop.f32.mrf.mxu1  ;;  %v494_v30 = vpop.f32.mrf.mxu0 }
  0xca   :  { %v120_v31 = vadd.f32 %v416_v26, %v119_v29  ;;  %v302_v32 = vmax.f32 %v299_v28, 0.0 }
  0xcb   :  { %v468_v33 = vpop.f32.mrf.mxu1 }
  0xcc   :  { %v123_v34 = vmax.f32 %v120_v31, 0.0  ;;  %512 = vmatmul.mubr.msk.f32.vlgmr.msra.gmra.mxu0 %vm128_vm3, %v302_v32 }
  0xce   :  { %486 = vmatmul.mubr.msk.f32.vlgmr.msra.gmra.mxu1 %vm128_vm3, %v123_v34 }
 0x18c   :  { %v376_v37 = vpop.f32.mrf.mxu0 }
 0x18d   :  { %v377_v38 = vadd.f32 %v430_v35, %v376_v37 }
 0x18e   :  { %v198_v39 = vpop.f32.mrf.mxu1  ;;  %v513_v40 = vpop.f32.mrf.mxu0 }
 0x18f   :  { %v199_v41 = vadd.f32 %v418_v36, %v198_v39  ;;  %v380_v44 = vmul.f32 %v377_v38, %v377_v38 }
 0x190   :  { %v487_v42 = vpop.f32.mrf.mxu1 }
 0x191   :  { %v202_v43 = vmul.f32 %v199_v41, %v199_v41  ;;  %v381_v46 = vsel %vm49_vm2, %v380_v44, 0.0 }
 0x193   :  { %v203_v45 = vsel %vm49_vm2, %v202_v43, 0.0 }
 0x194   :  { %204 = vadd.xlane.f32.xlu0 %v203_v45 }
 0x198   :  { %382 = vadd.xlane.f32.xlu0 %v381_v46 }
 0x21d   :  { %v205_v47 = vpop.xlane.xlu0 %204 }
 0x21e   :  { %v206_v48 = vmax.f32 %v205_v47, 1e-24 }
 0x220   :  { %518 = vrsqrt.f32 %v206_v48 }
 0x221   :  { %v383_v49 = vpop.xlane.xlu0 %382 }
 0x222   :  { %v384_v50 = vmax.f32 %v383_v49, 1e-24 }
 0x224   :  { %520 = vrsqrt.f32 %v384_v50 }
 0x22d   :  { %v519_v51 = vpop.eup %518 }
 0x22e   :  { %v208_v52 = vmul.f32 %v519_v51, %v199_v41 }
 0x230   :  { %209 = vst.msk [vmem:[#allocation2] sm:$0xff] %vm49_vm2, %v208_v52 }
 0x231   :  { %v521_v53 = vpop.eup %520 }
 0x232   :  { %533 = shalt.err (!%p530_p4)
}
 0x233   :  { %397 = dma.vmem_to_hbm [thread:$0]  %s395_s6, 128, %s747_s7, [#allocation3]   ;;  %v386_v54 = vmul.f32 %v521_v53, %v377_v38 }
 0x234   :  { %s542_s13 = scalar_lea.vmem %s405_s9, 128  ;;  %p547_p6 = scmp.lt.s32.totalorder %s405_s9, %s405_s9 }
 0x235   :  { %387 = vst.msk [vmem:[#allocation4] sm:$0xff] %vm49_vm2, %v386_v54  ;;  %p543_p5 = scmp.ne.s32.totalorder %s405_s9, %s542_s13  ;;  %p548_p7 = scmp.lt.s32.totalorder %s542_s13, %s542_s13 }
 0x237   :  { %p549_p8 = por %p548_p7, %p547_p6 }
 0x239   :  { %p550_p9 = pnand %p549_p8, %p543_p5 }
 0x23b   :  { %553 = shalt.err (!%p550_p9)
}
 0x23c   :  { %407 = dma.vmem_to_hbm [thread:$0]  %s405_s9, 128, %s748_s8, [#allocation5]  }
 0x23d   :  { %562 = dma.done.wait [#allocation3], 128  }
 0x23e   :  { %563 = vsyncadd [#allocation3], 4294967168 }
 0x23f   :  { %564 = dma.done.wait [#allocation5], 128  }
 0x240   :  { %565 = vsyncadd [#allocation5], 4294967168 }
 0x241   :  { %414 = vsyncpa [#allocation3], 1 }
 0x242   :  { %415 = vsyncpa [#allocation5], 1 }

</bundles_post_ra>
